<compile_context>
chip_gen: v6e
topology: v6e:2x2x1
jax: 0.10.0
libtpu: 0.0.40
codegen_flags: <defaults>
</compile_context>

<pallas_src>
import numpy as np
import jax
import jax.numpy as jnp
from jax.experimental import pallas as pl
from jax.experimental.pallas import tpu as pltpu


# ----------------------------- config (deterministic, in-script) -------------
NUM_CLASSES = 4
IOU_THRESHOLD = 0.5          # cfg.MODEL.ROI_HEADS.IOU_THRESHOLDS = [0.5]
IOU_LABELS = (0, 1)          # cfg.MODEL.ROI_HEADS.IOU_LABELS   = [0, 1]
BATCH_SIZE_PER_IMAGE = 16    # cfg.MODEL.ROI_HEADS.BATCH_SIZE_PER_IMAGE
POSITIVE_FRACTION = 0.25     # cfg.MODEL.ROI_HEADS.POSITIVE_FRACTION


def _round_up(x, m):
    return -(-x // m) * m


# ----------------------------- Pallas kernel ---------------------------------
def _make_roi_match_kernel(m_pad, n_blk, num_classes, iou_threshold):
    # power-of-two packing base so the idx/class split is a shift + mask.
    # All of these are plain Python ints/floats -> baked into the kernel as
    # literals, never captured as device constants.
    pack_k = 1 << max(int(num_classes) - 1, 0).bit_length()
    shift = pack_k.bit_length() - 1
    mask = pack_k - 1
    sentinel = int(m_pad) * pack_k          # larger than any real packed key
    thr = float(iou_threshold)
    lbl_pos = int(IOU_LABELS[1])
    lbl_neg = int(IOU_LABELS[0])
    bg_class = int(num_classes)

    def kernel(gt_ref, propT_ref, gtcls_ref, out_ref):
        # gt coords -> (m_pad, 1) columns (broadcast along lanes)
        gx1 = gt_ref[:, 0:1]
        gy1 = gt_ref[:, 1:2]
        gx2 = gt_ref[:, 2:3]
        gy2 = gt_ref[:, 3:4]
        # proposal coords -> (1, n_blk) rows (broadcast along sublanes)
        px1 = propT_ref[0:1, :]
        py1 = propT_ref[1:2, :]
        px2 = propT_ref[2:3, :]
        py2 = propT_ref[3:4, :]

        # ---- pairwise_iou (detectron2 semantics); (m_pad, n_blk) stays in VMEM ----
        iw = jnp.maximum(jnp.minimum(gx2, px2) - jnp.maximum(gx1, px1), 0.0)
        ih = jnp.maximum(jnp.minimum(gy2, py2) - jnp.maximum(gy1, py1), 0.0)
        inter = iw * ih                                      # (m_pad, n_blk)
        area_g = (gx2 - gx1) * (gy2 - gy1)                   # (m_pad, 1)
        area_p = (px2 - px1) * (py2 - py1)                   # (1, n_blk)
        union = jnp.maximum(area_g + area_p - inter, 1e-12)  # no 0/0 NaN lanes
        # Exact divide kept (not pl.reciprocal approx) so the bitwise IoU value
        # matches the torch reference; divide count is tiny here anyway.
        iou = jnp.where(inter > 0.0, inter / union, 0.0)     # (m_pad, n_blk)

        # ---- Matcher: max over gt axis (torch.max picks first tie) ----
        max_iou = jnp.max(iou, axis=0, keepdims=True)        # (1, n_blk) f32

        # ---- fused argmax-index + class gather: ONE min-reduce over M ----
        row_iota = jax.lax.broadcasted_iota(jnp.int32, (m_pad, n_blk), 0)
        packed = row_iota * pack_k + gtcls_ref[...]          # (m_pad, n_blk) i32
        packed = jnp.where(iou == max_iou, packed, sentinel)
        packed_min = jnp.min(packed, axis=0, keepdims=True)  # (1, n_blk)
        matched_idxs = jnp.right_shift(packed_min, shift)    # first-tie argmax
        gathered_cls = jnp.bitwise_and(packed_min, mask)

        # thresholds=[0.5], labels=[0,1], allow_low_quality_matches=False.
        # (IOU_LABELS contains no -1 "ignore" label, so that branch is omitted.)
        matched_labels = jnp.where(max_iou >= thr, lbl_pos, lbl_neg
                                   ).astype(jnp.int32)
        cls = jnp.where(matched_labels == 0, bg_class, gathered_cls
                        ).astype(jnp.int32)

        # ---- pack all per-proposal results into one full-sublane (8, n) slab ----
        row = jax.lax.broadcasted_iota(jnp.int32, (8, n_blk), 0)

        def bcast(x):
            return jnp.broadcast_to(x, (8, n_blk))

        miou_bits = jax.lax.bitcast_convert_type(max_iou, jnp.int32)
        slab = jnp.where(row == 0, bcast(miou_bits),
               jnp.where(row == 1, bcast(matched_idxs),
               jnp.where(row == 2, bcast(matched_labels),
               jnp.where(row == 3, bcast(cls), 0))))
        out_ref[...] = slab                                  # single unmasked store

    return kernel


# ----------------------------- wrapper ----------------------------------------
def roi_match_batched(gt_boxes, proposal_boxes, gt_classes,
                      num_classes=NUM_CLASSES, iou_threshold=IOU_THRESHOLD,
                      n_block=1024):
    """Hot path of _ROIHeads.label_and_sample_proposals, batched over images.

    Args:
      gt_boxes:       (I, M, 4) float32 [x1, y1, x2, y2]
      proposal_boxes: (I, N, 4) float32
      gt_classes:     (I, M)    int32
    Returns per-proposal arrays of shape (I, N):
      max_iou f32, matched_idxs i32, matched_labels i32, assigned gt_classes i32
    """
    num_images, m_gt, _ = gt_boxes.shape
    n_prop = proposal_boxes.shape[1]

    if m_gt == 0:
        # detectron2 no-GT case: everything is background.
        zeros = jnp.zeros((num_images, n_prop), jnp.int32)
        return (jnp.zeros((num_images, n_prop), jnp.float32), zeros, zeros,
                jnp.full((num_images, n_prop), num_classes, jnp.int32))

    # pad GT count to the f32 sublane tile (8); degenerate zero boxes give IoU 0,
    # so they never win a tie against a real gt box (row index 0 exists & wins).
    m_pad = _round_up(m_gt, 8)
    # lane-dense proposal tile: multiple of 128, capped at the padded N
    n_block = min(n_block, _round_up(n_prop, 128))
    n_pad = _round_up(n_prop, n_block)

    gt_pad = jnp.zeros((num_images, m_pad, 4), jnp.float32)
    gt_pad = gt_pad.at[:, :m_gt, :].set(gt_boxes.astype(jnp.float32))
    gtcls_pad = jnp.zeros((num_images, m_pad, 1), jnp.int32)
    gtcls_pad = gtcls_pad.at[:, :m_gt, 0].set(gt_classes.astype(jnp.int32))

    # proposals transposed so the proposal index maps onto the 128-lane axis
    propT = jnp.transpose(proposal_boxes.astype(jnp.float32), (0, 2, 1))  # (I,4,N)
    propT_pad = jnp.zeros((num_images, 4, n_pad), jnp.float32)
    propT_pad = propT_pad.at[:, :, :n_prop].set(propT)

    kernel = _make_roi_match_kernel(m_pad, n_block, num_classes, iou_threshold)

    slab = pl.pallas_call(
        kernel,
        out_shape=jax.ShapeDtypeStruct((num_images, 8, n_pad), jnp.int32),
        grid=(num_images, n_pad // n_block),
        in_specs=[
            pl.BlockSpec((None, m_pad, 4), lambda img, nt: (img, 0, 0)),
            pl.BlockSpec((None, 4, n_block), lambda img, nt: (img, 0, nt)),
            pl.BlockSpec((None, m_pad, 1), lambda img, nt: (img, 0, 0)),
        ],
        out_specs=pl.BlockSpec((None, 8, n_block), lambda img, nt: (img, 0, nt)),
        compiler_params=pltpu.CompilerParams(
            dimension_semantics=("parallel", "parallel")),
    )(gt_pad, propT_pad, gtcls_pad)

    slab = slab[:, :, :n_prop]
    max_iou = jax.lax.bitcast_convert_type(slab[:, 0, :], jnp.float32)
    matched_idxs = slab[:, 1, :]
    matched_labels = slab[:, 2, :]
    assigned_cls = slab[:, 3, :]
    return max_iou, matched_idxs, matched_labels, assigned_cls


# ----------------------------- glue: deterministic sampling ------------------
def sample_proposals_host(gt_classes_per_prop, batch_size_per_image,
                          positive_fraction, num_classes):
    """Deterministic stand-in for detectron2 subsample_labels (host glue).

    # TODO(synk): detectron2 uses torch.randperm for fg/bg subsampling; a random
    # permutation has no clean deterministic Pallas equivalent, so we take the
    # first-k fg/bg indices (same counts / quota logic, different statistics).
    """
    cls = np.asarray(gt_classes_per_prop)
    fg_idxs = np.nonzero((cls >= 0) & (cls != num_classes))[0]
    bg_idxs = np.nonzero(cls == num_classes)[0]
    num_fg = min(int(batch_size_per_image * positive_fraction), len(fg_idxs))
    num_bg = min(batch_size_per_image - num_fg, len(bg_idxs))
    return np.concatenate([fg_idxs[:num_fg], bg_idxs[:num_bg]]).astype(np.int64)


# ----------------------------- reference (plain numpy) ------------------------
def _reference_match(gt_boxes, proposal_boxes, gt_classes, num_classes, thr):
    g = np.asarray(gt_boxes, np.float32)
    p = np.asarray(proposal_boxes, np.float32)
    iw = np.clip(np.minimum(g[:, None, 2], p[None, :, 2]) -
                 np.maximum(g[:, None, 0], p[None, :, 0]), 0, None)
    ih = np.clip(np.minimum(g[:, None, 3], p[None, :, 3]) -
                 np.maximum(g[:, None, 1], p[None, :, 1]), 0, None)
    inter = iw * ih
    ag = (g[:, 2] - g[:, 0]) * (g[:, 3] - g[:, 1])
    ap = (p[:, 2] - p[:, 0]) * (p[:, 3] - p[:, 1])
    union = np.maximum(ag[:, None] + ap[None, :] - inter, 1e-12)
    iou = np.where(inter > 0, inter / union, 0.0)
    max_iou = iou.max(axis=0)
    midx = iou.argmax(axis=0).astype(np.int32)
    mlbl = (max_iou >= thr).astype(np.int32)
    cls = np.asarray(gt_classes)[midx]
    cls = np.where(mlbl == 0, num_classes, cls).astype(np.int32)
    return max_iou, midx, mlbl, cls


# ----------------------------- main -------------------------------------------
if __name__ == "__main__":
    NUM_IMAGES = 2
    M_GT = 8          # ground-truth boxes per image
    N_PROP = 1024     # proposals per image
    N_BLOCK = 1024    # lane tile for the proposal axis (multiple of 128)

    key = jax.random.PRNGKey(0)
    k1, k2, k3, k4, k5 = jax.random.split(key, 5)
    gxy = jax.random.uniform(k1, (NUM_IMAGES, M_GT, 2), minval=0.0, maxval=64.0)
    gwh = jax.random.uniform(k2, (NUM_IMAGES, M_GT, 2), minval=8.0, maxval=40.0)
    gt_boxes = jnp.concatenate([gxy, gxy + gwh], axis=-1)
    pxy = jax.random.uniform(k3, (NUM_IMAGES, N_PROP, 2), minval=0.0, maxval=64.0)
    pwh = jax.random.uniform(k4, (NUM_IMAGES, N_PROP, 2), minval=8.0, maxval=40.0)
    proposal_boxes = jnp.concatenate([pxy, pxy + pwh], axis=-1)
    gt_classes = jax.random.randint(k5, (NUM_IMAGES, M_GT), 0, NUM_CLASSES,
                                    jnp.int32)

    # single batched launch for all images; one host sync at the end
    roi_match = jax.jit(
        lambda g, p, c: roi_match_batched(g, p, c, n_block=N_BLOCK))
    max_iou, matched_idxs, matched_labels, assigned_cls = jax.block_until_ready(
        roi_match(gt_boxes, proposal_boxes, gt_classes))

    # single device->host transfer; reference check + sampling glue per image
    max_iou_h = np.asarray(max_iou)
    midx_h = np.asarray(matched_idxs)
    mlbl_h = np.asarray(matched_labels)
    cls_h = np.asarray(assigned_cls)
    gt_h = np.asarray(gt_boxes)
    pr_h = np.asarray(proposal_boxes)
    gc_h = np.asarray(gt_classes)

    results = []
    for img in range(NUM_IMAGES):
        r_max, r_idx, r_lbl, r_cls = _reference_match(
            gt_h[img], pr_h[img], gc_h[img], NUM_CLASSES, IOU_THRESHOLD)
        assert np.allclose(max_iou_h[img], r_max, atol=1e-5), "max IoU mismatch"
        assert np.array_equal(midx_h[img], r_idx), "matched_idxs mismatch"
        assert np.array_equal(mlbl_h[img], r_lbl), "matched_labels mismatch"
        assert np.array_equal(cls_h[img], r_cls), "gt_classes mismatch"

        sampled_idxs = sample_proposals_host(
            cls_h[img], BATCH_SIZE_PER_IMAGE, POSITIVE_FRACTION, NUM_CLASSES)
        results.append({
            "sampled_idxs": sampled_idxs,
            "gt_classes": cls_h[img][sampled_idxs],
            "iou": max_iou_h[img][sampled_idxs],
            "matched_idxs": midx_h[img][sampled_idxs],
        })

    # TODO(synk): _ROIHeads.forward() raises NotImplementedError in the base
    # class, and the Instances / add_ground_truth_to_proposals bookkeeping is
    # host-side glue; only the label_and_sample_proposals hot path is kernelized.
    print("KERNEL_OK")
</pallas_src>

<mosaic_0001>
module attributes {stable_mosaic.version = 11 : i64} {
  func.func @kernel(%arg0: i32, %arg1: i32, %arg2: memref<1x8x4xf32, #tpu.memory_space<vmem>>, %arg3: memref<1x4x1024xf32, #tpu.memory_space<vmem>>, %arg4: memref<1x8x1xi32, #tpu.memory_space<vmem>>, %arg5: memref<1x8x1024xi32, #tpu.memory_space<vmem>>) attributes {dimension_semantics = [#tpu.dimension_semantics<parallel>, #tpu.dimension_semantics<parallel>], iteration_bounds = array<i64: 2, 1>, scalar_prefetch = 0 : i64, scratch_operands = 0 : i64, tpu.core_type = #tpu.core_type<tc>, window_params = [{transform_indices = @transform_0, window_bounds = array<i64: 1, 8, 4>}, {transform_indices = @transform_1, window_bounds = array<i64: 1, 4, 1024>}, {transform_indices = @transform_2, window_bounds = array<i64: 1, 8, 1>}, {transform_indices = @transform_3, window_bounds = array<i64: 1, 8, 1024>}]} {
    %c0 = arith.constant 0 : index
    %c0_0 = arith.constant 0 : index
    %c0_1 = arith.constant 0 : index
    %0 = vector.load %arg2[%c0, %c0_0, %c0_1] : memref<1x8x4xf32, #tpu.memory_space<vmem>>, vector<1x8x1xf32>
    %1 = vector.shape_cast %0 : vector<1x8x1xf32> to vector<8x1xf32>
    %c0_2 = arith.constant 0 : index
    %c0_3 = arith.constant 0 : index
    %c1 = arith.constant 1 : index
    %2 = vector.load %arg2[%c0_2, %c0_3, %c1] : memref<1x8x4xf32, #tpu.memory_space<vmem>>, vector<1x8x1xf32>
    %3 = vector.shape_cast %2 : vector<1x8x1xf32> to vector<8x1xf32>
    %c0_4 = arith.constant 0 : index
    %c0_5 = arith.constant 0 : index
    %c2 = arith.constant 2 : index
    %4 = vector.load %arg2[%c0_4, %c0_5, %c2] : memref<1x8x4xf32, #tpu.memory_space<vmem>>, vector<1x8x1xf32>
    %5 = vector.shape_cast %4 : vector<1x8x1xf32> to vector<8x1xf32>
    %c0_6 = arith.constant 0 : index
    %c0_7 = arith.constant 0 : index
    %c3 = arith.constant 3 : index
    %6 = vector.load %arg2[%c0_6, %c0_7, %c3] : memref<1x8x4xf32, #tpu.memory_space<vmem>>, vector<1x8x1xf32>
    %7 = vector.shape_cast %6 : vector<1x8x1xf32> to vector<8x1xf32>
    %c0_8 = arith.constant 0 : index
    %c0_9 = arith.constant 0 : index
    %c0_10 = arith.constant 0 : index
    %8 = vector.load %arg3[%c0_8, %c0_9, %c0_10] : memref<1x4x1024xf32, #tpu.memory_space<vmem>>, vector<1x1x1024xf32>
    %9 = vector.shape_cast %8 : vector<1x1x1024xf32> to vector<1x1024xf32>
    %c0_11 = arith.constant 0 : index
    %c1_12 = arith.constant 1 : index
    %c0_13 = arith.constant 0 : index
    %10 = vector.load %arg3[%c0_11, %c1_12, %c0_13] : memref<1x4x1024xf32, #tpu.memory_space<vmem>>, vector<1x1x1024xf32>
    %11 = vector.shape_cast %10 : vector<1x1x1024xf32> to vector<1x1024xf32>
    %c0_14 = arith.constant 0 : index
    %c2_15 = arith.constant 2 : index
    %c0_16 = arith.constant 0 : index
    %12 = vector.load %arg3[%c0_14, %c2_15, %c0_16] : memref<1x4x1024xf32, #tpu.memory_space<vmem>>, vector<1x1x1024xf32>
    %13 = vector.shape_cast %12 : vector<1x1x1024xf32> to vector<1x1024xf32>
    %c0_17 = arith.constant 0 : index
    %c3_18 = arith.constant 3 : index
    %c0_19 = arith.constant 0 : index
    %14 = vector.load %arg3[%c0_17, %c3_18, %c0_19] : memref<1x4x1024xf32, #tpu.memory_space<vmem>>, vector<1x1x1024xf32>
    %15 = vector.shape_cast %14 : vector<1x1x1024xf32> to vector<1x1024xf32>
    %16 = vector.broadcast %5 : vector<8x1xf32> to vector<8x1024xf32>
    %17 = vector.broadcast %13 : vector<1x1024xf32> to vector<8x1024xf32>
    %18 = arith.minimumf %16, %17 : vector<8x1024xf32>
    %19 = vector.broadcast %1 : vector<8x1xf32> to vector<8x1024xf32>
    %20 = vector.broadcast %9 : vector<1x1024xf32> to vector<8x1024xf32>
    %21 = arith.maximumf %19, %20 : vector<8x1024xf32>
    %22 = arith.subf %18, %21 : vector<8x1024xf32>
    %cst = arith.constant 0.000000e+00 : f32
    %23 = vector.broadcast %cst : f32 to vector<8x1024xf32>
    %24 = arith.maximumf %22, %23 : vector<8x1024xf32>
    %25 = vector.broadcast %7 : vector<8x1xf32> to vector<8x1024xf32>
    %26 = vector.broadcast %15 : vector<1x1024xf32> to vector<8x1024xf32>
    %27 = arith.minimumf %25, %26 : vector<8x1024xf32>
    %28 = vector.broadcast %3 : vector<8x1xf32> to vector<8x1024xf32>
    %29 = vector.broadcast %11 : vector<1x1024xf32> to vector<8x1024xf32>
    %30 = arith.maximumf %28, %29 : vector<8x1024xf32>
    %31 = arith.subf %27, %30 : vector<8x1024xf32>
    %cst_20 = arith.constant 0.000000e+00 : f32
    %32 = vector.broadcast %cst_20 : f32 to vector<8x1024xf32>
    %33 = arith.maximumf %31, %32 : vector<8x1024xf32>
    %34 = arith.mulf %24, %33 : vector<8x1024xf32>
    %35 = arith.subf %5, %1 : vector<8x1xf32>
    %36 = arith.subf %7, %3 : vector<8x1xf32>
    %37 = arith.mulf %35, %36 : vector<8x1xf32>
    %38 = arith.subf %13, %9 : vector<1x1024xf32>
    %39 = arith.subf %15, %11 : vector<1x1024xf32>
    %40 = arith.mulf %38, %39 : vector<1x1024xf32>
    %41 = vector.broadcast %37 : vector<8x1xf32> to vector<8x1024xf32>
    %42 = vector.broadcast %40 : vector<1x1024xf32> to vector<8x1024xf32>
    %43 = arith.addf %41, %42 : vector<8x1024xf32>
    %44 = arith.subf %43, %34 : vector<8x1024xf32>
    %cst_21 = arith.constant 9.99999996E-13 : f32
    %45 = vector.broadcast %cst_21 : f32 to vector<8x1024xf32>
    %46 = arith.maximumf %44, %45 : vector<8x1024xf32>
    %cst_22 = arith.constant 0.000000e+00 : f32
    %47 = vector.broadcast %cst_22 : f32 to vector<8x1024xf32>
    %48 = arith.cmpf ogt, %34, %47 : vector<8x1024xf32>
    %49 = arith.divf %34, %46 : vector<8x1024xf32>
    %cst_23 = arith.constant 0.000000e+00 : f32
    %50 = vector.broadcast %cst_23 : f32 to vector<8x1024xf32>
    %51 = arith.select %48, %49, %50 : vector<8x1024xi1>, vector<8x1024xf32>
    %cst_24 = arith.constant dense<0xFF800000> : vector<1024xf32>
    %52 = vector.multi_reduction <maximumf>, %51, %cst_24 [0] : vector<8x1024xf32> to vector<1024xf32>
    %53 = vector.shape_cast %52 : vector<1024xf32> to vector<1x1024xf32>
    %54 = tpu.iota {dimensions = array<i32: 0>} : vector<8x1024xi32>
    %c4_i32 = arith.constant 4 : i32
    %55 = vector.broadcast %c4_i32 : i32 to vector<8x1024xi32>
    %56 = arith.muli %54, %55 : vector<8x1024xi32>
    %c0_25 = arith.constant 0 : index
    %c0_26 = arith.constant 0 : index
    %c0_27 = arith.constant 0 : index
    %57 = vector.load %arg4[%c0_25, %c0_26, %c0_27] : memref<1x8x1xi32, #tpu.memory_space<vmem>>, vector<1x8x1xi32>
    %58 = vector.shape_cast %57 : vector<1x8x1xi32> to vector<8x1xi32>
    %59 = vector.broadcast %58 : vector<8x1xi32> to vector<8x1024xi32>
    %60 = arith.addi %56, %59 : vector<8x1024xi32>
    %61 = vector.broadcast %53 : vector<1x1024xf32> to vector<8x1024xf32>
    %62 = arith.cmpf oeq, %51, %61 : vector<8x1024xf32>
    %c32_i32 = arith.constant 32 : i32
    %63 = vector.broadcast %c32_i32 : i32 to vector<8x1024xi32>
    %64 = arith.select %62, %60, %63 : vector<8x1024xi1>, vector<8x1024xi32>
    %cst_28 = arith.constant dense<2147483647> : vector<1024xi32>
    %65 = vector.multi_reduction <minsi>, %64, %cst_28 [0] : vector<8x1024xi32> to vector<1024xi32>
    %66 = vector.shape_cast %65 : vector<1024xi32> to vector<1x1024xi32>
    %c2_i32 = arith.constant 2 : i32
    %67 = vector.broadcast %c2_i32 : i32 to vector<1x1024xi32>
    %68 = arith.shrsi %66, %67 : vector<1x1024xi32>
    %c3_i32 = arith.constant 3 : i32
    %69 = vector.broadcast %c3_i32 : i32 to vector<1x1024xi32>
    %70 = arith.andi %66, %69 : vector<1x1024xi32>
    %cst_29 = arith.constant 5.000000e-01 : f32
    %71 = vector.broadcast %cst_29 : f32 to vector<1x1024xf32>
    %72 = arith.cmpf oge, %53, %71 : vector<1x1024xf32>
    %c1_i32 = arith.constant 1 : i32
    %c0_i32 = arith.constant 0 : i32
    %73 = vector.broadcast %c1_i32 : i32 to vector<1x1024xi32>
    %74 = vector.broadcast %c0_i32 : i32 to vector<1x1024xi32>
    %75 = arith.select %72, %73, %74 : vector<1x1024xi1>, vector<1x1024xi32>
    %c0_i32_30 = arith.constant 0 : i32
    %76 = vector.broadcast %c0_i32_30 : i32 to vector<1x1024xi32>
    %77 = arith.cmpi eq, %75, %76 : vector<1x1024xi32>
    %c4_i32_31 = arith.constant 4 : i32
    %78 = vector.broadcast %c4_i32_31 : i32 to vector<1x1024xi32>
    %79 = arith.select %77, %78, %70 : vector<1x1024xi1>, vector<1x1024xi32>
    %80 = tpu.iota {dimensions = array<i32: 0>} : vector<8x1024xi32>
    %81 = tpu.bitcast %53 : vector<1x1024xf32> -> vector<1x1024xi32>
    %c0_i32_32 = arith.constant 0 : i32
    %82 = vector.broadcast %c0_i32_32 : i32 to vector<8x1024xi32>
    %83 = arith.cmpi eq, %80, %82 : vector<8x1024xi32>
    %84 = vector.shape_cast %81 : vector<1x1024xi32> to vector<1x1024xi32>
    %85 = vector.broadcast %84 : vector<1x1024xi32> to vector<8x1024xi32>
    %c1_i32_33 = arith.constant 1 : i32
    %86 = vector.broadcast %c1_i32_33 : i32 to vector<8x1024xi32>
    %87 = arith.cmpi eq, %80, %86 : vector<8x1024xi32>
    %88 = vector.shape_cast %68 : vector<1x1024xi32> to vector<1x1024xi32>
    %89 = vector.broadcast %88 : vector<1x1024xi32> to vector<8x1024xi32>
    %c2_i32_34 = arith.constant 2 : i32
    %90 = vector.broadcast %c2_i32_34 : i32 to vector<8x1024xi32>
    %91 = arith.cmpi eq, %80, %90 : vector<8x1024xi32>
    %92 = vector.shape_cast %75 : vector<1x1024xi32> to vector<1x1024xi32>
    %93 = vector.broadcast %92 : vector<1x1024xi32> to vector<8x1024xi32>
    %c3_i32_35 = arith.constant 3 : i32
    %94 = vector.broadcast %c3_i32_35 : i32 to vector<8x1024xi32>
    %95 = arith.cmpi eq, %80, %94 : vector<8x1024xi32>
    %96 = vector.shape_cast %79 : vector<1x1024xi32> to vector<1x1024xi32>
    %97 = vector.broadcast %96 : vector<1x1024xi32> to vector<8x1024xi32>
    %c0_i32_36 = arith.constant 0 : i32
    %98 = vector.broadcast %c0_i32_36 : i32 to vector<8x1024xi32>
    %99 = arith.select %95, %97, %98 : vector<8x1024xi1>, vector<8x1024xi32>
    %100 = arith.select %91, %93, %99 : vector<8x1024xi1>, vector<8x1024xi32>
    %101 = arith.select %87, %89, %100 : vector<8x1024xi1>, vector<8x1024xi32>
    %102 = arith.select %83, %85, %101 : vector<8x1024xi1>, vector<8x1024xi32>
    %c0_37 = arith.constant 0 : index
    %c0_38 = arith.constant 0 : index
    %c0_39 = arith.constant 0 : index
    %103 = vector.load %arg5[%c0_37, %c0_38, %c0_39] : memref<1x8x1024xi32, #tpu.memory_space<vmem>>, vector<1x8x1024xi32>
    %104 = vector.shape_cast %103 : vector<1x8x1024xi32> to vector<8x1024xi32>
    %105 = vector.shape_cast %102 : vector<8x1024xi32> to vector<1x8x1024xi32>
    tpu.vector_store %arg5[%c0_37, %c0_38, %c0_39], %105 {strides = array<i32>} : memref<1x8x1024xi32, #tpu.memory_space<vmem>>, vector<1x8x1024xi32>,
    return
  }
  func.func @transform_0(%arg0: i32, %arg1: i32) -> (i32, i32, i32) {
    %c0_i32 = arith.constant 0 : i32
    %c0_i32_0 = arith.constant 0 : i32
    %c0_i32_1 = arith.constant 0 : i32
    return %arg0, %c0_i32, %c0_i32_0 : i32, i32, i32
  }
  func.func @transform_1(%arg0: i32, %arg1: i32) -> (i32, i32, i32) {
    %c0_i32 = arith.constant 0 : i32
    %c0_i32_0 = arith.constant 0 : i32
    return %arg0, %c0_i32, %arg1 : i32, i32, i32
  }
  func.func @transform_2(%arg0: i32, %arg1: i32) -> (i32, i32, i32) {
    %c0_i32 = arith.constant 0 : i32
    %c0_i32_0 = arith.constant 0 : i32
    %c0_i32_1 = arith.constant 0 : i32
    return %arg0, %c0_i32, %c0_i32_0 : i32, i32, i32
  }
  func.func @transform_3(%arg0: i32, %arg1: i32) -> (i32, i32, i32) {
    %c0_i32 = arith.constant 0 : i32
    %c0_i32_0 = arith.constant 0 : i32
    return %arg0, %c0_i32, %arg1 : i32, i32, i32
  }
}

</mosaic_0001>

<bundles_post_ra>
// kernel: _lambda_.1
= control target key start
LH: loop header
LB: loop body
LE: loop exit
PB: predicated region body
PF: predicated region fallthrough
CT: control target
= control target key end

     0   :  { %8 = vsyncpa [#allocation3], 0  ;;  %s1737_s0 = inlined_call_operand.vmem [shape: f32[2,8,4], index: 0, kind: input, shape index: {}]   ;;  %s1738_s1 = inlined_call_operand.hbm [shape: f32[2,4,1024], index: 1, kind: input, shape index: {}]   ;;  %s1739_s2 = inlined_call_operand.vmem [shape: s32[2,8,1], index: 2, kind: input, shape index: {}]   ;;  %s1740_s3 = inlined_call_operand.vmem [shape: s32[2,8,1024], index: 3, kind: output, shape index: {}]  }
   0x1   :  { %10 = vsyncpa [#allocation3 + $0x1], 0  ;;  %s1215_s12 = smov 0   ;;  %s1217_s13 = smov 0  }
   0x2   :  { %s1219_s14 = smov 0   ;;  %s1221_s15 = smov 0  }
   0x3   :  { %s1223_s16 = smov 0   ;;  %s1225_s17 = smov 0  }
   0x4 LB: > { %s989_s18 = sadd.s32 4294967295, %s1186_s17   ;;  %s28_s19 = sadd.s32 1, %s1182_s16  ;;  %s1186_s17 = sphi %s1225_s17, %s16_s17   ;;  %s1182_s16 = sphi %s1223_s16, %s1760_s16   ;;  %s1178_s15 = sphi %s1221_s15, %s1759_s15   ;;  %s1174_s14 = sphi %s1219_s14, %s1758_s14   ;;  %s1170_s13 = sphi %s1217_s13, %s1757_s13   ;;  %s1166_s12 = sphi %s1215_s12, %s1756_s12  }
   0x5   : > { %p30_p0 = scmp.ge.s32.totalorder %s28_s19, 2  ;;  %s63_s20 = sadd.s32 1, %s1174_s14 }
   0x6   : > { %p70_p1 = scmp.ne.s32.totalorder %s1174_s14, %s1170_s13  ;;  %p71_p2 = scmp.eq.s32.totalorder %s1186_s17, 0 }
   0x7   : > { %s1762_s19 = smov (%p30_p0, %s28_s19), 0  ;;  %p76_p4 = scmp.ne.s32.totalorder %s1170_s13, %s1166_s12 }
   0x8   : > { %p1251_p3 = por %p71_p2, %p70_p1  ;;  %s58_s22 = ssub.s32 %s1182_s16, %s1762_s19 }
   0x9   : > { %p77_p5 = scmp.eq.s32.totalorder %s989_s18, 0  ;;  %p61_p6 = scmp.eq.s32.totalorder %s58_s22, 0 }
   0xa   : > { %p1031_p8 = scmp.lt.s32.totalorder %s1186_s17, 2  ;;  %s161_s25 = sand.u32 1, %s1174_s14  }
   0xb   : > { %p1258_p7 = por %p77_p5, %p76_p4  ;;  %s1023_s26 = sshll.u32 %s1182_s16, 9 }
   0xc   : > { %s1264_s24 = scalar_select %p61_p6, %s1174_s14, %s63_s20  }
   0xd   : > { %s993_s27 = sshll.u32 %s161_s25, 5  ;;  %s173_s30 = scalar_lea.hbm %s1738_s1, %s1023_s26 }
   0xe   : > { %s165_s4 = scalar_lea.vmem [#allocation2], %s993_s27  ;;  %p1273_p9 = pnand %p1031_p8, %p1251_p3 }
   0xf   : > { %s175_s5 = sshll.u32 %s165_s4, 4  ;;  %p996_p10 = scmp.ge.s32.totalorder %s1186_s17, 1  ;;  %s176_s5 = int_to_ptr.vmem [resolvable:$true] %s175_s5 }
  0x10   : > { %p187_p11 = scmp.lt.s32.totalorder %s1186_s17, 3  ;;  %s162_s7 = scalar_lea.sflag [#allocation3], %s161_s25 }
  0x11   : > { %p1110_p12 = pneg %p1273_p9  ;;  %s1121_s8 = scalar_lea.vmem %s176_s5, 512 }
  0x12   : > { %p1122_p13 = scmp.ne.s32.totalorder %s176_s5, %s1121_s8  ;;  %s1188_s9 = smov [#allocation2]  }
  0x13   : > { %s1126_s10 = sshll.u32 %s1188_s9, 4  ;;  %s1127_s10 = int_to_ptr.vmem [resolvable:$false] %s1126_s10 }
  0x14   : > { %p1124_p0 = pnand %p1122_p13, %p1110_p12  ;;  %s1128_s11 = scalar_lea.vmem %s1127_s10, 1024 }
  0x15   : > { %p1129_p2 = scmp.lt.s32.totalorder %s176_s5, %s1127_s10  ;;  %p1130_p3 = scmp.lt.s32.totalorder %s1128_s11, %s1121_s8 }
  0x16   : > { %p1125_p1 = pneg %p1124_p0 }
  0x17   : > { %p1131_p4 = por %p1130_p3, %p1129_p2 }
  0x19   : > { %p1132_p5 = pnand %p1131_p4, %p1125_p1 }
  0x1b   : > { %1135 = shalt.err (!%p1132_p5)
}
  0x1c   : > { %1030 = dma.hbm_to_vmem [thread:$0]  (!%p1273_p9), %s173_s30, 512, %s176_s5, %s162_s7  }
  0x1d   : > { %p188_p6 = pnand %p996_p10, %p187_p11 }
  0x1f   : > { %191 = sbr.rel (%p188_p6) target bundleno = 487 (0x1e7), region = 32 }
  0x24   : > { %s193_s12 = sand.u32 1, %s1170_s13  }
  0x25   : > { %s997_s18 = sshll.u32 %s193_s12, 5  ;;  %s194_s20 = scalar_lea.sflag [#allocation3], %s193_s12 }
  0x26   : > { %s1288_s21 = scalar_lea.vmem [#allocation2], %s997_s18 }
  0x27   : > { %1161 = dma.done.wait (%p1258_p7), %s194_s20, 512  }
  0x28   : > { %1163 = vsyncadd (%p1258_p7), %s194_s20, 4294966784  ;;  %p232_p8 = scmp.lt.s32.totalorder %s1178_s15, 1  ;;  %v1189_v0 = vmov 2   ;;  %v1190_v1 = vmov 3   ;;  %s1191_s28 = smov 2   ;;  %v1741_v3 = vmov 0   ;;  %v265_v10 = vlaneseq }
  0x29   : > { %1086 = vset.pattern.permute.xlu1 %v1189_v0  ;;  %1088 = vset.pattern.permute.xlu0 %v1190_v1  ;;  %v1193_v4 = vmov 1   ;;  %s1194_s23 = smov 127   ;;  %v1003_v14 = vld [vmem:[%s1288_s21 + $0x2] ss:$4 sm:$0xff]  ;;  %v252_v22 = vld [vmem:[%s1288_s21] ss:$4 sm:$0xff] }
  0x2a   : > { %s1764_s15 = smov (!%p232_p8, %s1178_s15), 1  ;;  %v1307_v11 = vshrl.u32 %v265_v10, 7  ;;  %v1346_v33 = vld [vmem:[%s1288_s21 + $0x1] ss:$4 sm:$0xff]  ;;  %v1349_v34 = vld [vmem:[%s1288_s21 + $0x3] ss:$4 sm:$0xff]  ;;  %v521_v37 = vsub.f32 %v1003_v14, %v252_v22 }
  0x2b   : > { %s998_s22 = sshll.u32 %s1764_s15, 3  ;;  %v522_v38 = vsub.f32 %v1349_v34, %v1346_v33  ;;  %s1024_s5 = sshll.u32 %s1764_s15, 6 }
  0x2c   : > { %s235_s27 = scalar_lea.vmem %s1737_s0, %s998_s22  ;;  %s240_s4 = scalar_lea.vmem %s1739_s2, %s998_s22  ;;  %1750 = vst [vmem:[#allocation5_spill] sm:$0xff] %v1307_v11  ;;  %v1310_v12 = vsub.s32 0, %v1307_v11  ;;  %v1313_v13 = vsub.s32 1, %v1307_v11  ;;  %v1317_v15 = vsub.s32 2, %v1307_v11  ;;  %v1320_v16 = vsub.s32 3, %v1307_v11 }
  0x2d   : > { %v251_v2 = vld [vmem:[%s235_s27] sm:$0xff]  ;;  %v1323_v17 = vsub.s32 4, %v1307_v11  ;;  %v1326_v18 = vsub.s32 5, %v1307_v11  ;;  %v1329_v19 = vsub.s32 6, %v1307_v11  ;;  %v1332_v20 = vsub.s32 7, %v1307_v11  ;;  %s249_s7 = scalar_lea.vmem %s1740_s3, %s1024_s5 }
  0x2e   : > { %512 = vrot.lane.b32.xlu0 %v251_v2, %s1191_s28  ;;  %261 = vperm.xlu1 %1086, %v251_v2   ;;  %v677_v7 = vld [vmem:[%s240_s4] sm:$0xff]  ;;  %v268_v23 = vrot.slane %v1003_v14, %v1310_v12  ;;  %v272_v24 = vrot.slane %v1003_v14, %v1313_v13  ;;  %v276_v25 = vrot.slane %v1003_v14, %v1317_v15 }
  0x2f   : > { %v280_v26 = vrot.slane %v1003_v14, %v1320_v16  ;;  %v284_v27 = vrot.slane %v1003_v14, %v1323_v17  ;;  %v288_v28 = vrot.slane %v1003_v14, %v1326_v18  ;;  %v292_v29 = vrot.slane %v1003_v14, %v1329_v19 }
  0x30   : > { %v296_v30 = vrot.slane %v1003_v14, %v1332_v20  ;;  %v321_v31 = vrot.slane %v252_v22, %v1310_v12  ;;  %v325_v32 = vrot.slane %v252_v22, %v1313_v13  ;;  %v329_v35 = vrot.slane %v252_v22, %v1317_v15 }
  0x31   : > { %v333_v36 = vrot.slane %v252_v22, %v1320_v16  ;;  %v337_v39 = vrot.slane %v252_v22, %v1323_v17  ;;  %v341_v40 = vrot.slane %v252_v22, %v1326_v18  ;;  %v345_v41 = vrot.slane %v252_v22, %v1329_v19 }
  0x32   : > { %1087 = vset.pattern.permute.xlu1 %v1741_v3  ;;  %v349_v42 = vrot.slane %v252_v22, %v1332_v20  ;;  %v443_v44 = vrot.slane %v1346_v33, %v1310_v12  ;;  %v447_v45 = vrot.slane %v1346_v33, %v1313_v13  ;;  %v451_v46 = vrot.slane %v1346_v33, %v1317_v15 }
  0x33   : > { %314 = vperm.xlu1 %1087, %v251_v2   ;;  %v455_v47 = vrot.slane %v1346_v33, %v1320_v16  ;;  %v459_v48 = vrot.slane %v1346_v33, %v1323_v17  ;;  %v463_v49 = vrot.slane %v1346_v33, %v1326_v18  ;;  %v467_v50 = vrot.slane %v1346_v33, %v1329_v19 }
  0x34   : > { %v471_v51 = vrot.slane %v1346_v33, %v1332_v20  ;;  %v390_v52 = vrot.slane %v1349_v34, %v1310_v12  ;;  %v394_v53 = vrot.slane %v1349_v34, %v1313_v13  ;;  %v398_v54 = vrot.slane %v1349_v34, %v1317_v15 }
  0x35   : > { %v1381_v55 = vmul.f32 %v522_v38, %v521_v37  ;;  %v402_v56 = vrot.slane %v1349_v34, %v1320_v16  ;;  %v406_v57 = vrot.slane %v1349_v34, %v1323_v17  ;;  %v410_v58 = vrot.slane %v1349_v34, %v1326_v18 }
  0x36   : > { %v414_v59 = vrot.slane %v1349_v34, %v1329_v19  ;;  %v418_v63 = vrot.slane %v1349_v34, %v1332_v20 }
  0x37   : > { %1089 = vset.pattern.permute.xlu1 %v1193_v4 }
  0x38   : > { %436 = vperm.xlu1 %1089, %v251_v2  }
  0x3c   : > { %1090 = vset.pattern.permute.xlu1 %v1189_v0 }
  0xa0   : > { %v513_v5 = vpop.permute.xlu0 %512 }
  0xa1   : > { %v515_v6 = vsub.f32 %v251_v2, %v513_v5 }
  0xa3   : > { %517 = vrot.lane.b32.xlu0 %v515_v6, %s1194_s23 }
  0xa7   : > { %383 = vperm.xlu0 %1088, %v251_v2  }
  0xa9   : > { %v262_v21 = vpop.permute.xlu1 %261 }
  0xaa   : > { %v305_v60 = vmin.f32 %v262_v21, %v268_v23  ;;  %v306_v61 = vmin.f32 %v262_v21, %v272_v24  ;;  %v307_v62 = vmin.f32 %v262_v21, %v276_v25  ;;  %v308_v0 = vmin.f32 %v262_v21, %v280_v26 }
  0xab   : > { %1091 = vset.pattern.permute.xlu0 %v1741_v3  ;;  %v309_v1 = vmin.f32 %v262_v21, %v284_v27  ;;  %v310_v2 = vmin.f32 %v262_v21, %v288_v28  ;;  %v311_v4 = vmin.f32 %v262_v21, %v292_v29 }
  0xac   : > { %679 = vperm.xlu0 %1091, %v677_v7  }
  0xae   : > { %v315_v43 = vpop.permute.xlu1 %314 }
  0xaf   : > { %v358_v7 = vmax.f32 %v315_v43, %v321_v31  ;;  %v360_v10 = vmax.f32 %v315_v43, %v329_v35  ;;  %v361_v14 = vmax.f32 %v315_v43, %v333_v36  ;;  %v362_v22 = vmax.f32 %v315_v43, %v337_v39 }
  0xb0   : > { %v363_v23 = vmax.f32 %v315_v43, %v341_v40  ;;  %v364_v25 = vmax.f32 %v315_v43, %v345_v41  ;;  %v365_v33 = vmax.f32 %v315_v43, %v349_v42 }
  0xb1   : > { %v366_v36 = vsub.f32 %v305_v60, %v358_v7  ;;  %v368_v40 = vsub.f32 %v307_v62, %v360_v10  ;;  %v369_v11 = vsub.f32 %v308_v0, %v361_v14  ;;  %v370_v41 = vsub.f32 %v309_v1, %v362_v22 }
  0xb2   : > { %v371_v42 = vsub.f32 %v310_v2, %v363_v23  ;;  %v553_v10 = vrot.slane %v1381_v55, %v1326_v18  ;;  %v557_v14 = vrot.slane %v1381_v55, %v1329_v19  ;;  %v561_v22 = vrot.slane %v1381_v55, %v1332_v20 }
  0xb3   : > { %v437_v5 = vpop.permute.xlu1 %436  ;;  %v378_v60 = vmax.f32 %v370_v41, 0.0  ;;  %v1751_v18 = vrot.slane %v1381_v55, %v1310_v12 }
  0xb4   : > { %v480_v37 = vmax.f32 %v437_v5, %v443_v44  ;;  %v481_v34 = vmax.f32 %v437_v5, %v447_v45  ;;  %v482_v26 = vmax.f32 %v437_v5, %v451_v46  ;;  %v483_v27 = vmax.f32 %v437_v5, %v455_v47 }
  0xb5   : > { %v484_v28 = vmax.f32 %v437_v5, %v459_v48  ;;  %v485_v29 = vmax.f32 %v437_v5, %v463_v49  ;;  %v486_v38 = vmax.f32 %v437_v5, %v467_v50  ;;  %v487_v44 = vmax.f32 %v437_v5, %v471_v51 }
 0x115   : > { %v518_v8 = vpop.permute.xlu0 %517 }
 0x116   : > { %v520_v9 = vmul.f32 %v518_v8, %v515_v6  ;;  %v312_v6 = vmin.f32 %v262_v21, %v296_v30  ;;  %v359_v8 = vmax.f32 %v315_v43, %v325_v32  ;;  %v372_v43 = vsub.f32 %v311_v4, %v364_v25 }
 0x118   : > { %526 = vperm.xlu1 %1090, %v520_v9   ;;  %v367_v39 = vsub.f32 %v306_v61, %v359_v8  ;;  %v379_v61 = vmax.f32 %v371_v42, 0.0  ;;  %v380_v62 = vmax.f32 %v372_v43, 0.0 }
 0x122   : > { %v384_v24 = vpop.permute.xlu0 %383 }
 0x123   : > { %v427_v21 = vmin.f32 %v384_v24, %v390_v52  ;;  %v428_v30 = vmin.f32 %v384_v24, %v394_v53  ;;  %v429_v31 = vmin.f32 %v384_v24, %v398_v54  ;;  %v430_v32 = vmin.f32 %v384_v24, %v402_v56 }
 0x124   : > { %v431_v3 = vmin.f32 %v384_v24, %v406_v57  ;;  %v432_v9 = vmin.f32 %v384_v24, %v410_v58  ;;  %v433_v35 = vmin.f32 %v384_v24, %v414_v59  ;;  %v434_v45 = vmin.f32 %v384_v24, %v418_v63 }
 0x125   : > { %v488_v46 = vsub.f32 %v427_v21, %v480_v37  ;;  %v489_v47 = vsub.f32 %v428_v30, %v481_v34  ;;  %v490_v48 = vsub.f32 %v429_v31, %v482_v26  ;;  %v491_v49 = vsub.f32 %v430_v32, %v483_v27 }
 0x126   : > { %v492_v50 = vsub.f32 %v431_v3, %v484_v28  ;;  %v493_v52 = vsub.f32 %v432_v9, %v485_v29  ;;  %v494_v53 = vsub.f32 %v433_v35, %v486_v38  ;;  %v373_v54 = vsub.f32 %v312_v6, %v365_v33 }
 0x127   : > { %v374_v56 = vmax.f32 %v366_v36, 0.0  ;;  %v375_v57 = vmax.f32 %v367_v39, 0.0  ;;  %v376_v58 = vmax.f32 %v368_v40, 0.0  ;;  %v377_v59 = vmax.f32 %v369_v11, 0.0 }
 0x128   : > { %v495_v0 = vsub.f32 %v434_v45, %v487_v44  ;;  %v496_v1 = vmax.f32 %v488_v46, 0.0  ;;  %v497_v2 = vmax.f32 %v489_v47, 0.0  ;;  %v498_v51 = vmax.f32 %v490_v48, 0.0 }
 0x129   : > { %v499_v63 = vmax.f32 %v491_v49, 0.0  ;;  %v500_v4 = vmax.f32 %v492_v50, 0.0  ;;  %v501_v5 = vmax.f32 %v493_v52, 0.0  ;;  %v502_v7 = vmax.f32 %v494_v53, 0.0  ;;  %v1752_v52 = vld [vmem:[#allocation5_spill] sm:$0xff] }
 0x12a   : > { %v381_v8 = vmax.f32 %v373_v54, 0.0  ;;  %v537_v3 = vrot.slane %v1381_v55, %v1313_v13  ;;  %v541_v6 = vrot.slane %v1381_v55, %v1317_v15  ;;  %v545_v11 = vrot.slane %v1381_v55, %v1320_v16 }
 0x12b   : > { %v549_v9 = vrot.slane %v1381_v55, %v1323_v17  ;;  %v503_v23 = vmax.f32 %v495_v0, 0.0  ;;  %v504_v13 = vmul.f32 %v496_v1, %v374_v56  ;;  %v505_v24 = vmul.f32 %v497_v2, %v375_v57  ;;  %v680_v57 = vpop.permute.xlu0 %679 }
 0x12c   : > { %v1409_v25 = vmul.f32 %v498_v51, %v376_v58  ;;  %v1411_v33 = vmul.f32 %v499_v63, %v377_v59  ;;  %v1413_v16 = vmul.f32 %v500_v4, %v378_v60  ;;  %v1415_v17 = vmul.f32 %v501_v5, %v379_v61 }
 0x12d   : > { %v1417_v37 = vmul.f32 %v502_v7, %v380_v62  ;;  %v1424_v35 = vmul.f32 %v503_v23, %v381_v8  ;;  %vm594_vm0 = vcmp.gt.f32.partialorder %v504_v13, 0.0  ;;  %vm595_vm1 = vcmp.gt.f32.partialorder %v505_v24, 0.0 }
 0x12e   : > { %v676_v53 = vmul.u32 4, %v1752_v52  ;;  %vm596_vm2 = vcmp.gt.f32.partialorder %v1409_v25, 0.0  ;;  %vm597_vm3 = vcmp.gt.f32.partialorder %v1411_v33, 0.0  ;;  %vm598_vm4 = vcmp.gt.f32.partialorder %v1413_v16, 0.0 }
 0x12f   : > { %vm599_vm5 = vcmp.gt.f32.partialorder %v1415_v17, 0.0  ;;  %vm600_vm6 = vcmp.gt.f32.partialorder %v1417_v37, 0.0  ;;  %vm601_vm7 = vcmp.gt.f32.partialorder %v1424_v35, 0.0 }
 0x130   : > { %v1451_v5 = vadd.s32 %v680_v57, %v676_v53 }
 0x193   : > { %v527_v15 = vpop.permute.xlu1 %526 }
 0x194   : > { %v570_v19 = vadd.f32 %v1751_v18, %v527_v15  ;;  %v571_v34 = vadd.f32 %v537_v3, %v527_v15  ;;  %v572_v20 = vadd.f32 %v541_v6, %v527_v15  ;;  %v573_v26 = vadd.f32 %v545_v11, %v527_v15 }
 0x195   : > { %v574_v27 = vadd.f32 %v549_v9, %v527_v15  ;;  %v575_v28 = vadd.f32 %v553_v10, %v527_v15  ;;  %v576_v29 = vadd.f32 %v557_v14, %v527_v15  ;;  %v577_v38 = vadd.f32 %v561_v22, %v527_v15 }
 0x196   : > { %v578_v21 = vsub.f32 %v570_v19, %v504_v13  ;;  %v579_v30 = vsub.f32 %v571_v34, %v505_v24  ;;  %v580_v31 = vsub.f32 %v572_v20, %v1409_v25  ;;  %v581_v32 = vsub.f32 %v573_v26, %v1411_v33 }
 0x197   : > { %v582_v36 = vsub.f32 %v574_v27, %v1413_v16  ;;  %v583_v12 = vsub.f32 %v575_v28, %v1415_v17  ;;  %v584_v55 = vsub.f32 %v576_v29, %v1417_v37  ;;  %v585_v42 = vsub.f32 %v577_v38, %v1424_v35 }
 0x198   : > { %v586_v39 = vmax.f32 %v578_v21, 1e-12  ;;  %v587_v40 = vmax.f32 %v579_v30, 1e-12  ;;  %v588_v41 = vmax.f32 %v580_v31, 1e-12 }
 0x199   : > { %v589_v43 = vmax.f32 %v581_v32, 1e-12  ;;  %v590_v44 = vmax.f32 %v582_v36, 1e-12  ;;  %v591_v45 = vmax.f32 %v583_v12, 1e-12 }
 0x19a   : > { %1092 = vrcp.f32 %v586_v39  ;;  %v592_v46 = vmax.f32 %v584_v55, 1e-12  ;;  %v593_v47 = vmax.f32 %v585_v42, 1e-12 }
 0x19b   : > { %1094 = vrcp.f32 %v587_v40 }
 0x19c   : > { %1096 = vrcp.f32 %v588_v41 }
 0x19d   : > { %1098 = vrcp.f32 %v589_v43 }
 0x19e   : > { %1100 = vrcp.f32 %v590_v44 }
 0x19f   : > { %1102 = vrcp.f32 %v591_v45 }
 0x1a0   : > { %1104 = vrcp.f32 %v592_v46 }
 0x1a1   : > { %1106 = vrcp.f32 %v593_v47 }
 0x1a7   : > { %v1093_v48 = vpop.eup %1092 }
 0x1a8   : > { %v1095_v49 = vpop.eup %1094  ;;  %v603_v50 = vmul.f32 %v1093_v48, %v504_v13 }
 0x1a9   : > { %v1097_v54 = vpop.eup %1096  ;;  %v605_v56 = vmul.f32 %v1095_v49, %v505_v24 }
 0x1aa   : > { %v1099_v58 = vpop.eup %1098  ;;  %v607_v59 = vmul.f32 %v1097_v54, %v1409_v25  ;;  %v1437_v60 = vsel %vm594_vm0, %v603_v50, 0.0 }
 0x1ab   : > { %v1101_v61 = vpop.eup %1100  ;;  %v609_v62 = vmul.f32 %v1099_v58, %v1411_v33  ;;  %v1442_v0 = vsel %vm595_vm1, %v605_v56, 0.0  ;;  %v626_v1 = vrot.slane %v1437_v60, 4 }
 0x1ac   : > { %v1103_v2 = vpop.eup %1102  ;;  %v611_v51 = vmul.f32 %v1101_v61, %v1413_v16  ;;  %v1448_v63 = vsel %vm596_vm2, %v607_v59, 0.0  ;;  %v632_v4 = vrot.slane %v1442_v0, 4 }
 0x1ad   : > { %v1105_v7 = vpop.eup %1104  ;;  %v613_v8 = vmul.f32 %v1103_v2, %v1415_v17  ;;  %v1456_v3 = vsel %vm597_vm3, %v609_v62, 0.0  ;;  %v627_v6 = vmax.f32 %v1437_v60, %v626_v1  ;;  %v638_v11 = vrot.slane %v1448_v63, 4 }
 0x1ae   : > { %v1107_v9 = vpop.eup %1106  ;;  %v615_v10 = vmul.f32 %v1105_v7, %v1417_v37  ;;  %v1463_v14 = vsel %vm598_vm4, %v611_v51, 0.0  ;;  %v633_v22 = vmax.f32 %v1442_v0, %v632_v4  ;;  %v644_v23 = vrot.slane %v1456_v3, 4 }
 0x1af   : > { %v617_v13 = vmul.f32 %v1107_v9, %v1424_v35  ;;  %v1470_v24 = vsel %vm599_vm5, %v613_v8, 0.0  ;;  %v628_v25 = vrot.slane %v627_v6, 2  ;;  %v639_v15 = vmax.f32 %v1448_v63, %v638_v11 }
 0x1b0   : > { %v1475_v33 = vsel %vm600_vm6, %v615_v10, 0.0  ;;  %v634_v16 = vrot.slane %v633_v22, 2  ;;  %v645_v18 = vmax.f32 %v1456_v3, %v644_v23  ;;  %v650_v19 = vrot.slane %v1463_v14, 4 }
 0x1b1   : > { %v1481_v34 = vsel %vm601_vm7, %v617_v13, 0.0  ;;  %v629_v20 = vmax.f32 %v627_v6, %v628_v25  ;;  %v640_v17 = vrot.slane %v639_v15, 2  ;;  %v656_v26 = vrot.slane %v1470_v24, 4 }
 0x1b2   : > { %v635_v27 = vmax.f32 %v633_v22, %v634_v16  ;;  %v646_v28 = vrot.slane %v645_v18, 2  ;;  %v651_v29 = vmax.f32 %v1463_v14, %v650_v19  ;;  %v662_v37 = vrot.slane %v1475_v33, 4 }
 0x1b3   : > { %v630_v38 = vrot.slane %v629_v20, 1  ;;  %v641_v21 = vmax.f32 %v639_v15, %v640_v17  ;;  %v657_v30 = vmax.f32 %v1470_v24, %v656_v26  ;;  %v668_v31 = vrot.slane %v1481_v34, 4 }
 0x1b4   : > { %v636_v32 = vrot.slane %v635_v27, 1  ;;  %v647_v35 = vmax.f32 %v645_v18, %v646_v28  ;;  %v652_v36 = vrot.slane %v651_v29, 2  ;;  %v663_v12 = vmax.f32 %v1475_v33, %v662_v37 }
 0x1b5   : > { %v1489_v55 = vmax.f32 %v629_v20, %v630_v38  ;;  %v642_v39 = vrot.slane %v641_v21, 1  ;;  %v658_v40 = vrot.slane %v657_v30, 2  ;;  %v669_v41 = vmax.f32 %v1481_v34, %v668_v31 }
 0x1b6   : > { %v1492_v42 = vmax.f32 %v635_v27, %v636_v32  ;;  %v648_v43 = vrot.slane %v647_v35, 1  ;;  %v653_v44 = vmax.f32 %v651_v29, %v652_v36  ;;  %v664_v45 = vrot.slane %v663_v12, 2 }
 0x1b7   : > { %v1494_v46 = vmax.f32 %v641_v21, %v642_v39  ;;  %v659_v47 = vmax.f32 %v657_v30, %v658_v40  ;;  %v670_v48 = vrot.slane %v669_v41, 2  ;;  %vm682_vm8 = vcmp.eq.f32.partialorder %v1437_v60, %v1489_v55 }
 0x1b8   : > { %v1498_v49 = vmax.f32 %v647_v35, %v648_v43  ;;  %v654_v50 = vrot.slane %v653_v44, 1  ;;  %v665_v53 = vmax.f32 %v663_v12, %v664_v45  ;;  %vm683_vm9 = vcmp.eq.f32.partialorder %v1442_v0, %v1492_v42 }
 0x1b9   : > { %v660_v54 = vrot.slane %v659_v47, 1  ;;  %v671_v56 = vmax.f32 %v669_v41, %v670_v48  ;;  %vm684_vm10 = vcmp.eq.f32.partialorder %v1448_v63, %v1494_v46  ;;  %vm786_vm11 = vcmp.ge.f32.partialorder %v1489_v55, 0.5 }
 0x1ba   : > { %v1505_v57 = vmax.f32 %v653_v44, %v654_v50  ;;  %v666_v58 = vrot.slane %v665_v53, 1  ;;  %vm685_vm12 = vcmp.eq.f32.partialorder %v1456_v3, %v1498_v49  ;;  %vm787_vm13 = vcmp.ge.f32.partialorder %v1492_v42, 0.5 }
 0x1bb   : > { %v1510_v59 = vmax.f32 %v659_v47, %v660_v54  ;;  %v672_v61 = vrot.slane %v671_v56, 1  ;;  %vm788_vm14 = vcmp.ge.f32.partialorder %v1494_v46, 0.5  ;;  %vm789_vm15 = vcmp.ge.f32.partialorder %v1498_v49, 0.5 }
 0x1bc   : > { %v1514_v62 = vmax.f32 %v665_v53, %v666_v58  ;;  %vm686_vm0 = vcmp.eq.f32.partialorder %v1463_v14, %v1505_v57  ;;  %vm790_vm1 = vcmp.ge.f32.partialorder %v1505_v57, 0.5  ;;  %v1753_v1 = vmov 0  }
 0x1bd   : > { %v1522_v2 = vsel %vm786_vm11, 1, %v1753_v1  ;;  %v1524_v51 = vmax.f32 %v671_v56, %v672_v61  ;;  %vm687_vm2 = vcmp.eq.f32.partialorder %v1470_v24, %v1510_v59  ;;  %vm791_vm3 = vcmp.ge.f32.partialorder %v1510_v59, 0.5 }
 0x1be   : > { %v1532_v4 = vsel %vm787_vm13, 1, %v1753_v1  ;;  %vm688_vm4 = vcmp.eq.f32.partialorder %v1475_v33, %v1514_v62  ;;  %vm1746_vm5 = vcmp.ge.f32.partialorder %v1514_v62, 0.5  ;;  %v1540_v7 = vsel %vm788_vm14, 1, %v1753_v1 }
 0x1bf   : > { %v1545_v8 = vsel %vm789_vm15, 1, %v1753_v1  ;;  %vm689_vm6 = vcmp.eq.f32.partialorder %v1481_v34, %v1524_v51  ;;  %vm1745_vm7 = vcmp.ge.f32.partialorder %v1524_v51, 0.5  ;;  %v1553_v6 = vsel %vm790_vm1, 1, %v1753_v1 }
 0x1c0   : > { %v1558_v11 = vsel %vm791_vm3, 1, %v1753_v1  ;;  %v1563_v9 = vsel %vm1746_vm5, 1, %v1753_v1  ;;  %v1568_v10 = vsel %vm1745_vm7, 1, %v1753_v1  ;;  %v690_v22 = vsel %vm682_vm8, %v1451_v5, 32 }
 0x1c1   : > { %v691_v23 = vsel %vm683_vm9, %v1451_v5, 32  ;;  %v692_v13 = vsel %vm684_vm10, %v1451_v5, 32  ;;  %v693_v25 = vsel %vm685_vm12, %v1451_v5, 32  ;;  %v694_v60 = vsel %vm686_vm0, %v1451_v5, 32 }
 0x1c2   : > { %v695_v0 = vsel %vm687_vm2, %v1451_v5, 32  ;;  %v696_v63 = vsel %vm688_vm4, %v1451_v5, 32  ;;  %v697_v15 = vsel %vm689_vm6, %v1451_v5, 32  ;;  %v698_v16 = vrot.slane %v690_v22, 4 }
 0x1c3   : > { %v707_v3 = vrot.slane %v691_v23, 4  ;;  %v716_v18 = vrot.slane %v692_v13, 4  ;;  %v725_v19 = vrot.slane %v693_v25, 4  ;;  %v734_v34 = vrot.slane %v694_v60, 4 }
 0x1c4   : > { %v743_v20 = vrot.slane %v695_v0, 4  ;;  %vm699_vm8 = vcmp.lt.s32.totalorder %v690_v22, %v698_v16  ;;  %v752_v14 = vrot.slane %v696_v63, 4  ;;  %v761_v17 = vrot.slane %v697_v15, 4 }
 0x1c5   : > { %vm708_vm9 = vcmp.lt.s32.totalorder %v691_v23, %v707_v3  ;;  %v700_v26 = vsel %vm699_vm8, %v690_v22, %v698_v16  ;;  %vm717_vm10 = vcmp.lt.s32.totalorder %v692_v13, %v716_v18  ;;  %vm726_vm12 = vcmp.lt.s32.totalorder %v693_v25, %v725_v19 }
 0x1c6   : > { %v709_v24 = vsel %vm708_vm9, %v691_v23, %v707_v3  ;;  %v701_v27 = vrot.slane %v700_v26, 2  ;;  %v718_v33 = vsel %vm717_vm10, %v692_v13, %v716_v18  ;;  %v727_v29 = vsel %vm726_vm12, %v693_v25, %v725_v19 }
 0x1c7   : > { %v710_v28 = vrot.slane %v709_v24, 2  ;;  %v719_v37 = vrot.slane %v718_v33, 2  ;;  %v728_v5 = vrot.slane %v727_v29, 2  ;;  %vm735_vm0 = vcmp.lt.s32.totalorder %v694_v60, %v734_v34 }
 0x1c8   : > { %vm744_vm2 = vcmp.lt.s32.totalorder %v695_v0, %v743_v20  ;;  %vm702_vm4 = vcmp.lt.s32.totalorder %v700_v26, %v701_v27  ;;  %v736_v38 = vsel %vm735_vm0, %v694_v60, %v734_v34  ;;  %vm753_vm10 = vcmp.lt.s32.totalorder %v696_v63, %v752_v14 }
 0x1c9   : > { %vm711_vm6 = vcmp.lt.s32.totalorder %v709_v24, %v710_v28  ;;  %v745_v21 = vsel %vm744_vm2, %v695_v0, %v743_v20  ;;  %v703_v30 = vsel %vm702_vm4, %v700_v26, %v701_v27  ;;  %vm720_vm7 = vcmp.lt.s32.totalorder %v718_v33, %v719_v37 }
 0x1ca   : > { %v712_v31 = vsel %vm711_vm6, %v709_v24, %v710_v28  ;;  %vm729_vm5 = vcmp.lt.s32.totalorder %v727_v29, %v728_v5  ;;  %v704_v32 = vrot.slane %v703_v30, 1  ;;  %v721_v36 = vsel %vm720_vm7, %v718_v33, %v719_v37 }
 0x1cb   : > { %v713_v35 = vrot.slane %v712_v31, 1  ;;  %v730_v12 = vsel %vm729_vm5, %v727_v29, %v728_v5  ;;  %v722_v39 = vrot.slane %v721_v36, 1  ;;  %v737_v41 = vrot.slane %v736_v38, 2 }
 0x1cc   : > { %v731_v40 = vrot.slane %v730_v12, 1  ;;  %v746_v43 = vrot.slane %v745_v21, 2  ;;  %vm705_vm8 = vcmp.lt.s32.totalorder %v703_v30, %v704_v32  ;;  %vm762_vm12 = vcmp.lt.s32.totalorder %v697_v15, %v761_v17 }
 0x1cd   : > { %vm714_vm9 = vcmp.lt.s32.totalorder %v712_v31, %v713_v35  ;;  %v1599_v44 = vsel %vm705_vm8, %v703_v30, %v704_v32  ;;  %vm723_vm0 = vcmp.lt.s32.totalorder %v721_v36, %v722_v39  ;;  %vm738_vm7 = vcmp.lt.s32.totalorder %v736_v38, %v737_v41 }
 0x1ce   : > { %v1601_v45 = vsel %vm714_vm9, %v712_v31, %v713_v35  ;;  %vm732_vm2 = vcmp.lt.s32.totalorder %v730_v12, %v731_v40  ;;  %v1603_v47 = vsel %vm723_vm0, %v721_v36, %v722_v39  ;;  %vm747_vm5 = vcmp.lt.s32.totalorder %v745_v21, %v746_v43 }
 0x1cf   : > { %v1605_v48 = vsel %vm732_vm2, %v730_v12, %v731_v40  ;;  %vm829_vm4 = vcmp.eq.s32.totalorder %v1752_v52, 3  ;;  %v739_v50 = vsel %vm738_vm7, %v736_v38, %v737_v41  ;;  %v748_v53 = vsel %vm747_vm5, %v745_v21, %v746_v43 }
 0x1d0   : > { %v754_v54 = vsel %vm753_vm10, %v696_v63, %v752_v14  ;;  %v763_v56 = vsel %vm762_vm12, %v697_v15, %v761_v17  ;;  %v740_v58 = vrot.slane %v739_v50, 1  ;;  %v749_v61 = vrot.slane %v748_v53, 1 }
 0x1d1   : > { %v755_v1 = vrot.slane %v754_v54, 2  ;;  %v764_v22 = vrot.slane %v763_v56, 2  ;;  %vm828_vm6 = vcmp.eq.s32.totalorder %v1752_v52, 2  ;;  %v770_v23 = vshra.s32 %v1599_v44, 2 }
 0x1d2   : > { %v771_v13 = vshra.s32 %v1601_v45, 2  ;;  %v772_v25 = vshra.s32 %v1603_v47, 2  ;;  %v773_v60 = vshra.s32 %v1605_v48, 2  ;;  %vm741_vm8 = vcmp.lt.s32.totalorder %v739_v50, %v740_v58 }
 0x1d3   : > { %vm750_vm9 = vcmp.lt.s32.totalorder %v748_v53, %v749_v61  ;;  %vm756_vm0 = vcmp.lt.s32.totalorder %v754_v54, %v755_v1  ;;  %vm765_vm2 = vcmp.lt.s32.totalorder %v763_v56, %v764_v22  ;;  %vm827_vm10 = vcmp.eq.s32.totalorder %v1752_v52, 1 }
 0x1d4   : > { %v742_v0 = vsel %vm741_vm8, %v739_v50, %v740_v58  ;;  %v751_v63 = vsel %vm750_vm9, %v748_v53, %v749_v61  ;;  %v757_v15 = vsel %vm756_vm0, %v754_v54, %v755_v1  ;;  %v766_v16 = vsel %vm765_vm2, %v763_v56, %v764_v22 }
 0x1d5   : > { %v758_v3 = vrot.slane %v757_v15, 1  ;;  %v767_v18 = vrot.slane %v766_v16, 1  ;;  %v774_v19 = vshra.s32 %v742_v0, 2  ;;  %v775_v34 = vshra.s32 %v751_v63, 2 }
 0x1d6   : > { %vm826_vm12 = vcmp.eq.s32.totalorder %v1752_v52, 0  ;;  %v778_v20 = vand.u32 3, %v1599_v44  ;;  %v779_v14 = vand.u32 3, %v1601_v45  ;;  %v780_v17 = vand.u32 3, %v1603_v47 }
 0x1d7   : > { %v781_v26 = vand.u32 3, %v1605_v48  ;;  %vm759_vm7 = vcmp.lt.s32.totalorder %v757_v15, %v758_v3  ;;  %vm768_vm5 = vcmp.lt.s32.totalorder %v766_v16, %v767_v18  ;;  %v782_v24 = vand.u32 3, %v742_v0 }
 0x1d8   : > { %v783_v27 = vand.u32 3, %v751_v63  ;;  %v760_v28 = vsel %vm759_vm7, %v757_v15, %v758_v3  ;;  %v769_v33 = vsel %vm768_vm5, %v766_v16, %v767_v18  ;;  %v1013_v29 = vsel %vm786_vm11, %v778_v20, 4 }
 0x1d9   : > { %v1014_v37 = vsel %vm787_vm13, %v779_v14, 4  ;;  %v776_v5 = vshra.s32 %v760_v28, 2  ;;  %v777_v38 = vshra.s32 %v769_v33, 2  ;;  %v784_v21 = vand.u32 3, %v760_v28 }
 0x1da   : > { %v785_v30 = vand.u32 3, %v769_v33  ;;  %v1015_v31 = vsel %vm788_vm14, %v780_v17, 4  ;;  %v1016_v32 = vsel %vm789_vm15, %v781_v26, 4  ;;  %v1017_v35 = vsel %vm790_vm1, %v782_v24, 4 }
 0x1db   : > { %v1018_v36 = vsel %vm791_vm3, %v783_v27, 4  ;;  %vm1754_vm11 = vcmp.ge.f32.partialorder %v1514_v62, 0.5  ;;  %vm1755_vm13 = vcmp.ge.f32.partialorder %v1524_v51, 0.5  ;;  %v830_v40 = vsel %vm829_vm4, %v1013_v29, 0 }
 0x1dc   : > { %v1019_v12 = vsel %vm1754_vm11, %v784_v21, 4  ;;  %v1020_v39 = vsel %vm1755_vm13, %v785_v30, 4  ;;  %v831_v41 = vsel %vm829_vm4, %v1014_v37, 0  ;;  %v832_v43 = vsel %vm829_vm4, %v1015_v31, 0 }
 0x1dd   : > { %v833_v44 = vsel %vm829_vm4, %v1016_v32, 0  ;;  %v834_v45 = vsel %vm829_vm4, %v1017_v35, 0  ;;  %v835_v47 = vsel %vm829_vm4, %v1018_v36, 0  ;;  %v836_v48 = vsel %vm829_vm4, %v1019_v12, 0 }
 0x1de   : > { %v837_v50 = vsel %vm829_vm4, %v1020_v39, 0  ;;  %v838_v53 = vsel %vm828_vm6, %v1522_v2, %v830_v40  ;;  %v839_v54 = vsel %vm828_vm6, %v1532_v4, %v831_v41  ;;  %v840_v56 = vsel %vm828_vm6, %v1540_v7, %v832_v43 }
 0x1df   : > { %v841_v58 = vsel %vm828_vm6, %v1545_v8, %v833_v44  ;;  %v842_v61 = vsel %vm828_vm6, %v1553_v6, %v834_v45  ;;  %v843_v2 = vsel %vm828_vm6, %v1558_v11, %v835_v47  ;;  %v844_v4 = vsel %vm828_vm6, %v1563_v9, %v836_v48 }
 0x1e0   : > { %v845_v7 = vsel %vm828_vm6, %v1568_v10, %v837_v50  ;;  %v846_v8 = vsel %vm827_vm10, %v770_v23, %v838_v53  ;;  %v847_v6 = vsel %vm827_vm10, %v771_v13, %v839_v54  ;;  %v848_v11 = vsel %vm827_vm10, %v772_v25, %v840_v56 }
 0x1e1   : > { %v849_v1 = vsel %vm827_vm10, %v773_v60, %v841_v58  ;;  %v850_v22 = vsel %vm827_vm10, %v774_v19, %v842_v61  ;;  %v851_v9 = vsel %vm827_vm10, %v775_v34, %v843_v2  ;;  %v852_v10 = vsel %vm827_vm10, %v776_v5, %v844_v4 }
 0x1e2   : > { %v853_v23 = vsel %vm827_vm10, %v777_v38, %v845_v7  ;;  %v854_v13 = vsel %vm826_vm12, %v1489_v55, %v846_v8  ;;  %v855_v25 = vsel %vm826_vm12, %v1492_v42, %v847_v6  ;;  %v856_v60 = vsel %vm826_vm12, %v1494_v46, %v848_v11 }
 0x1e3   : > { %v857_v0 = vsel %vm826_vm12, %v1498_v49, %v849_v1  ;;  %v858_v63 = vsel %vm826_vm12, %v1505_v57, %v850_v22  ;;  %v859_v55 = vsel %vm826_vm12, %v1510_v59, %v851_v9  ;;  %862 = vst [vmem:[%s249_s7] sm:$0xff] %v854_v13  ;;  %863 = vst [vmem:[%s249_s7 + $0x8] sm:$0xff] %v855_v25 }
 0x1e4   : > { %v860_v42 = vsel %vm826_vm12, %v1514_v62, %v852_v10  ;;  %v861_v46 = vsel %vm826_vm12, %v1524_v51, %v853_v23  ;;  %864 = vst [vmem:[%s249_s7 + $0x10] sm:$0xff] %v856_v60  ;;  %865 = vst [vmem:[%s249_s7 + $0x18] sm:$0xff] %v857_v0 }
 0x1e5   : > { %866 = vst [vmem:[%s249_s7 + $0x20] sm:$0xff] %v858_v63  ;;  %867 = vst [vmem:[%s249_s7 + $0x28] sm:$0xff] %v859_v55 }
 0x1e6   : > { %868 = vst [vmem:[%s249_s7 + $0x30] sm:$0xff] %v860_v42  ;;  %869 = vst [vmem:[%s249_s7 + $0x38] sm:$0xff] %v861_v46 }
 0x1e7 PF: > { %s16_s17 = sadd.s32 1, %s1186_s17   ;;  %s1756_s12 = smov %s1170_s13 }
 0x1e8   : > { %p13_p7 = scmp.ge.s32.totalorder %s16_s17, 4   ;;  %s1757_s13 = smov %s1174_s14 }
 0x1e9   : > { %s1758_s14 = smov %s1264_s24  ;;  %s1759_s15 = smov %s1182_s16 }
 0x1ea   : > { %s1760_s16 = smov %s1762_s19  ;;  %15 = sbr.rel (!%p13_p7) target bundleno = 4 (0x4), region = 81 }
 0x1ef   :  { %900 = vsyncpa [#allocation3], 1 }
 0x1f0   :  { %902 = vsyncpa [#allocation3 + $0x1], 1 }

</bundles_post_ra>
